<compile_context>
chip_gen: v5e
topology: v5e:2x2
jax: 0.10.0
libtpu: 0.0.40
codegen_flags: <defaults>
</compile_context>

<pallas_src>
import jax
import jax.numpy as jnp
from jax.experimental import pallas as pl
from jax.experimental.pallas import tpu as pltpu


def _identity_copy_kernel(x_ref, o_ref):
    # x_ref, o_ref: (TR, L) lane-dense tiles in VMEM. Pure whole-tile copy.
    o_ref[...] = x_ref[...]


def unflatten2d(x, img_shape, *, target_tile_bytes=6 * 1024 * 1024):
    """x: (N, C*H*W) -> (N, C, H, W), matching torch x.view(-1, C, H, W)."""
    C, H, W = img_shape
    F = C * H * W
    assert x.shape[-1] == F, "last dim must equal C*H*W"
    N = x.shape[0]
    total = N * F
    # TODO(synk): sub-byte packed dtypes (int4/fp4) would need packed-layout
    # aware tile math; itemsize below assumes byte-addressable dtypes.
    itemsize = jnp.dtype(x.dtype).itemsize
    total_bytes = total * itemsize

    # ---- choose a lane-dense flat slab (R, L): L % 128 == 0, R * L == total.
    if total % 128 == 0:
        q = total // 128
        d = 1
        # Largest divisor of q up to 64 -> L in [128, 8192] elems (<=32 KiB/row
        # for f32), so row tiling alone controls the VMEM footprint.
        for cand in range(min(64, q), 0, -1):
            if q % cand == 0:
                d = cand
                break
        L = 128 * d
    else:
        # Rare fallback: total not divisible by 128 -> keep (N, F) layout and
        # use the full (non-lane-dense) trailing dim as the block width.
        L = F
    R = total // L
    slab = x.reshape(R, L)  # free row-major metadata reshape

    row_bytes = L * itemsize

    # ---- row-tile selection: biggest multiple-of-8 tile within the budget.
    budget_rows = max(8, (target_tile_bytes // row_bytes) // 8 * 8)
    tr = R if R <= budget_rows else budget_rows

    # Guarantee >= 2 grid steps for mid-size inputs so both v7x TensorCores
    # stream disjoint halves of the copy (harmless on 1-TC v5e/v6e).
    if tr == R and R >= 16 and total_bytes >= (2 << 20):
        tr = max(8, (R // 2) // 8 * 8)

    # Snap tr down to a divisor of R when cheap, so the last grid step is not
    # a masked partial-sublane store (never shrink the tile by more than 2x).
    if tr < R and R % tr != 0:
        for cand in range(tr, max(8, tr // 2) - 1, -8):
            if R % cand == 0:
                tr = cand
                break

    grid = (pl.cdiv(R, tr),)
    tile_bytes = tr * row_bytes
    # 2 input bufs + 2 output bufs per tile, plus headroom; clamp to a value
    # that is safe on every generation (<= v7x's 32 MiB scoped budget).
    vmem_limit = min(max(4 * tile_bytes + (4 << 20), 16 << 20), 30 << 20)

    flat = pl.pallas_call(
        _identity_copy_kernel,
        out_shape=jax.ShapeDtypeStruct((R, L), x.dtype),
        grid=grid,
        in_specs=[pl.BlockSpec((tr, L), lambda i: (i, 0))],
        out_specs=pl.BlockSpec((tr, L), lambda i: (i, 0)),
        input_output_aliases={0: 0},
        cost_estimate=pl.CostEstimate(
            flops=0, transcendentals=0, bytes_accessed=2 * total_bytes),
        compiler_params=pltpu.CompilerParams(
            dimension_semantics=(pltpu.PARALLEL,),
            vmem_limit_bytes=vmem_limit),
    )(slab)

    # Free metadata-level reshape outside the kernel (no data movement).
    return flat.reshape(N, C, H, W)


if __name__ == "__main__":
    # Small shapes consistent with the module: batch=2, img_shape=(4, 16, 16)
    N, C, H, W = 2, 4, 16, 16
    key = jax.random.PRNGKey(0)
    x = jax.random.normal(key, (N, C * H * W), dtype=jnp.float32)

    out = unflatten2d(x, (C, H, W))
    out = jax.block_until_ready(out)

    # Reference semantics: torch x.view(-1, C, H, W) == row-major reshape.
    ref = jnp.reshape(x, (-1, C, H, W))
    assert out.shape == (N, C, H, W), out.shape
    assert out.dtype == x.dtype
    assert jnp.array_equal(out, ref), "mismatch vs reference reshape"

    print("KERNEL_OK")
</pallas_src>

<mosaic_0001>
module attributes {stable_mosaic.version = 11 : i64} {
  func.func @_identity_copy_kernel(%arg0: i32, %arg1: memref<1x2048xf32, #tpu.memory_space<vmem>>, %arg2: memref<1x2048xf32, #tpu.memory_space<vmem>>) attributes {dimension_semantics = [#tpu.dimension_semantics<parallel>], iteration_bounds = array<i64: 1>, scalar_prefetch = 0 : i64, scratch_operands = 0 : i64, tpu.core_type = #tpu.core_type<tc>, window_params = [{transform_indices = @transform_0, window_bounds = array<i64: 1, 2048>}, {transform_indices = @transform_1, window_bounds = array<i64: 1, 2048>}]} {
    %c0 = arith.constant 0 : index
    %c0_0 = arith.constant 0 : index
    %0 = vector.load %arg1[%c0, %c0_0] : memref<1x2048xf32, #tpu.memory_space<vmem>>, vector<1x2048xf32>
    %c0_1 = arith.constant 0 : index
    %c0_2 = arith.constant 0 : index
    %1 = vector.load %arg2[%c0_1, %c0_2] : memref<1x2048xf32, #tpu.memory_space<vmem>>, vector<1x2048xf32>
    tpu.vector_store %arg2[%c0_1, %c0_2], %0 {strides = array<i32>} : memref<1x2048xf32, #tpu.memory_space<vmem>>, vector<1x2048xf32>,
    return
  }
  func.func @transform_0(%arg0: i32) -> (i32, i32) {
    %c0_i32 = arith.constant 0 : i32
    %c0_i32_0 = arith.constant 0 : i32
    return %arg0, %c0_i32 : i32, i32
  }
  func.func @transform_1(%arg0: i32) -> (i32, i32) {
    %c0_i32 = arith.constant 0 : i32
    %c0_i32_0 = arith.constant 0 : i32
    return %arg0, %c0_i32 : i32, i32
  }
}

</mosaic_0001>

<bundles_post_ra>
// kernel: tpu_custom_call.1
= control target key start
LH: loop header
LB: loop body
LE: loop exit
PB: predicated region body
PF: predicated region fallthrough
CT: control target
= control target key end

     0   :  { %6 = vsyncpa [#allocation3], 0  ;;  %s116_s0 = inlined_call_operand.hbm [shape: f32[1,2048], index: 0, kind: input, shape index: {}, may-alias: {0,1}]   ;;  %s117_s1 = inlined_call_operand.hbm [shape: f32[1,2048], index: 1, kind: output, shape index: {}, may-alias: {0,1}]  }
   0x1   :  { %7 = vsyncpa [#allocation4], 0  ;;  %s13_s8 = sshll.u32 %s116_s0, 4  ;;  %s98_s9 = smov [#allocation2]   ;;  %s14_s8 = int_to_ptr.hbm [resolvable:$true] %s13_s8 }
   0x2   :  { %s15_s10 = sshll.u32 %s98_s9, 4  ;;  %s16_s10 = int_to_ptr.vmem [resolvable:$true] %s15_s10 }
   0x3   :  { %18 = dma.hbm_to_vmem [thread:$0]  %s14_s8, 256, %s16_s10, [#allocation3]  }
   0x4   :  { %94 = dma.done.wait [#allocation3], 256  }
   0x5   :  { %95 = vsyncadd [#allocation3], 4294967040  ;;  %s99_s11 = smov [#allocation5]   ;;  %s34_s15 = sshll.u32 %s117_s1, 4  ;;  %v23_v0 = vld [vmem:[#allocation2] sm:$0xff]  ;;  %v24_v1 = vld [vmem:[#allocation2 + $0x8] sm:$0xff]  ;;  %s35_s15 = int_to_ptr.hbm [resolvable:$true] %s34_s15 }
   0x6   :  { %s32_s12 = sshll.u32 %s99_s11, 4  ;;  %25 = vst [vmem:[#allocation5] sm:$0xff] %v23_v0  ;;  %s33_s12 = int_to_ptr.vmem [resolvable:$true] %s32_s12 }
   0x7   :  { %26 = vst [vmem:[#allocation5 + $0x8] sm:$0xff] %v24_v1 }
   0x8   :  { %37 = dma.vmem_to_hbm [thread:$0]  %s33_s12, 256, %s35_s15, [#allocation4]  }
   0x9   :  { %96 = dma.done.wait [#allocation4], 256  }
   0xa   :  { %97 = vsyncadd [#allocation4], 4294967040 }
   0xb   :  { %42 = vsyncpa [#allocation3], 1 }
   0xc   :  { %43 = vsyncpa [#allocation4], 1 }

</bundles_post_ra>
